<compile_context>
chip_gen: v5e
topology: v5e:2x2
jax: 0.10.0
libtpu: 0.0.40
codegen_flags: <defaults>
</compile_context>

<pallas_src>
import jax
import jax.numpy as jnp
from jax.experimental import pallas as pl
from jax.experimental.pallas import tpu as pltpu

N_ENCODE = 6
D_IN = 3 + 3 * 2 * N_ENCODE   # 39
FILTER = 128
D_OUT = 4


def _tnerf_kernel(x_ref, w1_ref, b1_ref, w2_ref, b2_ref, w3t_ref, b3_ref, ot_ref):
    # Layer 1: (tm, D_IN)bf16 @ (D_IN, FILTER)bf16 -> f32 accum; bias+ReLU in f32.
    h = jnp.dot(x_ref[...], w1_ref[...], preferred_element_type=jnp.float32)
    h = jnp.maximum(h + b1_ref[...], 0.0).astype(jnp.bfloat16)
    # Layer 2: (tm, FILTER) @ (FILTER, FILTER).
    h = jnp.dot(h, w2_ref[...], preferred_element_type=jnp.float32)
    h = jnp.maximum(h + b2_ref[...], 0.0).astype(jnp.bfloat16)
    # Layer 3, computed transposed so the only store is lane-dense:
    #   y_t[o, m] = sum_k w3t[o, k] * h[m, k]   -> (D_OUT, tm), tm on lanes.
    y_t = jax.lax.dot_general(
        w3t_ref[...], h,
        dimension_numbers=(((1,), (1,)), ((), ())),
        preferred_element_type=jnp.float32,
    )
    ot_ref[...] = (y_t + b3_ref[...]).astype(ot_ref.dtype)


def tnerf_forward(x, params, *, tm=256):
    """x: (N, D_IN) float32; returns (N, D_OUT) float32.

    params: w1 (D_IN,FILTER), b1 (1,FILTER), w2 (FILTER,FILTER), b2 (1,FILTER),
            w3t (D_OUT,FILTER)  [PyTorch (out,in) layout], b3 (D_OUT,1).
    """
    N, d_in = x.shape
    assert d_in == D_IN
    n_tiles = pl.cdiv(N, tm)
    n_pad = n_tiles * tm

    xb = x.astype(jnp.bfloat16)
    if n_pad != N:
        xb = jnp.pad(xb, ((0, n_pad - N), (0, 0)))

    # bf16 dot operands; biases stay f32 for the VPU-side bias/ReLU.
    w1 = params["w1"].astype(jnp.bfloat16)
    w2 = params["w2"].astype(jnp.bfloat16)
    w3t = params["w3t"].astype(jnp.bfloat16)
    b1 = params["b1"].astype(jnp.float32)
    b2 = params["b2"].astype(jnp.float32)
    b3 = params["b3"].astype(jnp.float32)

    cost = pl.CostEstimate(
        flops=2 * n_pad * (D_IN * FILTER + FILTER * FILTER + FILTER * D_OUT),
        transcendentals=0,
        bytes_accessed=(n_pad * D_IN * 2 + n_pad * D_OUT * 4
                        + (D_IN + FILTER + D_OUT) * FILTER * 2
                        + (2 * FILTER + D_OUT) * 4),
    )

    out_t = pl.pallas_call(
        _tnerf_kernel,
        out_shape=jax.ShapeDtypeStruct((D_OUT, n_pad), jnp.float32),
        grid_spec=pltpu.PrefetchScalarGridSpec(
            num_scalar_prefetch=0,
            grid=(n_tiles,),
            in_specs=[
                pl.BlockSpec((tm, D_IN), lambda i: (i, 0)),        # x row tile
                # Weights/biases are grid-invariant (index_map always (0, 0)):
                # fetched once, VMEM footprint < 100 KB even double-buffered.
                pl.BlockSpec((D_IN, FILTER), lambda i: (0, 0)),    # w1
                pl.BlockSpec((1, FILTER), lambda i: (0, 0)),       # b1
                pl.BlockSpec((FILTER, FILTER), lambda i: (0, 0)),  # w2
                pl.BlockSpec((1, FILTER), lambda i: (0, 0)),       # b2
                pl.BlockSpec((D_OUT, FILTER), lambda i: (0, 0)),   # w3 (out, in)
                pl.BlockSpec((D_OUT, 1), lambda i: (0, 0)),        # b3
            ],
            out_specs=pl.BlockSpec((D_OUT, tm), lambda i: (0, i)),  # lane-dense
        ),
        compiler_params=pltpu.CompilerParams(
            dimension_semantics=("parallel",),
        ),
        cost_estimate=cost,
    )(xb, w1, b1, w2, b2, w3t, b3)

    # Back to the module's (N, D_OUT) layout; cheap (16 B/row) XLA transpose.
    return out_t.T[:N]


def init_params(key):
    """Deterministic synthetic params. PyTorch Linear stores W as (out, in);
    layers 1/2 are transposed to (in, out) for y = x @ W, layer 3 keeps the
    PyTorch layout since the kernel computes it transposed."""
    k1, k2, k3, k4, k5, k6 = jax.random.split(key, 6)

    def linear(kw, kb, fan_in, fan_out):
        bound = 1.0 / jnp.sqrt(jnp.float32(fan_in))
        w = jax.random.uniform(kw, (fan_out, fan_in), jnp.float32, -bound, bound)
        b = jax.random.uniform(kb, (fan_out,), jnp.float32, -bound, bound)
        return w, b

    w1, b1 = linear(k1, k2, D_IN, FILTER)
    w2, b2 = linear(k3, k4, FILTER, FILTER)
    w3, b3 = linear(k5, k6, FILTER, D_OUT)
    return {
        "w1": w1.T, "b1": b1.reshape(1, FILTER),
        "w2": w2.T, "b2": b2.reshape(1, FILTER),
        "w3t": w3, "b3": b3.reshape(D_OUT, 1),
    }


def tnerf_ref(x, params):
    """JAX reference with the same bf16-operand / f32-accumulate numerics."""
    bf = jnp.bfloat16
    h = jnp.dot(x.astype(bf), params["w1"].astype(bf),
                preferred_element_type=jnp.float32) + params["b1"]
    h = jnp.maximum(h, 0.0)
    h = jnp.dot(h.astype(bf), params["w2"].astype(bf),
                preferred_element_type=jnp.float32) + params["b2"]
    h = jnp.maximum(h, 0.0)
    y = jnp.dot(h.astype(bf), params["w3t"].astype(bf).T,
                preferred_element_type=jnp.float32) + params["b3"].T
    return y


if __name__ == "__main__":
    key = jax.random.PRNGKey(0)
    kx, kp = jax.random.split(key)

    # Small example: 512 positional-encoded sample points (grid of 2 at tm=256).
    N = 512
    x = jax.random.normal(kx, (N, D_IN), jnp.float32)
    params = init_params(kp)

    out = tnerf_forward(x, params, tm=256)
    out = jax.block_until_ready(out)

    ref = tnerf_ref(x, params)
    assert out.shape == (N, D_OUT)
    assert jnp.allclose(out, ref, atol=2e-3, rtol=2e-3), "mismatch vs JAX reference"

    print("KERNEL_OK")
</pallas_src>

<mosaic_0001>
module attributes {stable_mosaic.version = 11 : i64} {
  func.func @_tnerf_kernel(%arg0: i32, %arg1: memref<256x39xbf16, #tpu.memory_space<vmem>>, %arg2: memref<39x128xbf16, #tpu.memory_space<vmem>>, %arg3: memref<1x128xf32, #tpu.memory_space<vmem>>, %arg4: memref<128x128xbf16, #tpu.memory_space<vmem>>, %arg5: memref<1x128xf32, #tpu.memory_space<vmem>>, %arg6: memref<4x128xbf16, #tpu.memory_space<vmem>>, %arg7: memref<4x1xf32, #tpu.memory_space<vmem>>, %arg8: memref<4x256xf32, #tpu.memory_space<vmem>>) attributes {dimension_semantics = [#tpu.dimension_semantics<parallel>], iteration_bounds = array<i64: 2>, scalar_prefetch = 0 : i64, scratch_operands = 0 : i64, tpu.core_type = #tpu.core_type<tc>, window_params = [{transform_indices = @transform_0, window_bounds = array<i64: 256, 39>}, {pipeline_mode = #tpu.pipeline_mode<synchronous>, transform_indices = @transform_1, window_bounds = array<i64: 39, 128>}, {pipeline_mode = #tpu.pipeline_mode<synchronous>, transform_indices = @transform_2, window_bounds = array<i64: 1, 128>}, {pipeline_mode = #tpu.pipeline_mode<synchronous>, transform_indices = @transform_3, window_bounds = array<i64: 128, 128>}, {pipeline_mode = #tpu.pipeline_mode<synchronous>, transform_indices = @transform_4, window_bounds = array<i64: 1, 128>}, {pipeline_mode = #tpu.pipeline_mode<synchronous>, transform_indices = @transform_5, window_bounds = array<i64: 4, 128>}, {pipeline_mode = #tpu.pipeline_mode<synchronous>, transform_indices = @transform_6, window_bounds = array<i64: 4, 1>}, {transform_indices = @transform_7, window_bounds = array<i64: 4, 256>}]} {
    %c0 = arith.constant 0 : index
    %c0_0 = arith.constant 0 : index
    %0 = vector.load %arg1[%c0, %c0_0] : memref<256x39xbf16, #tpu.memory_space<vmem>>, vector<256x39xbf16>
    %c0_1 = arith.constant 0 : index
    %c0_2 = arith.constant 0 : index
    %1 = vector.load %arg2[%c0_1, %c0_2] : memref<39x128xbf16, #tpu.memory_space<vmem>>, vector<39x128xbf16>
    %cst = arith.constant dense<0.000000e+00> : vector<256x128xf32>
    %2 = tpu.matmul %0, %1, %cst {dimension_numbers = #tpu.dot_dimension_numbers<[1], [0], [0], [1], [0, 0, 1, 1], [], []>} : vector<256x39xbf16>, vector<39x128xbf16>, vector<256x128xf32> -> vector<256x128xf32>
    %c0_3 = arith.constant 0 : index
    %c0_4 = arith.constant 0 : index
    %3 = vector.load %arg3[%c0_3, %c0_4] : memref<1x128xf32, #tpu.memory_space<vmem>>, vector<1x128xf32>
    %4 = vector.broadcast %3 : vector<1x128xf32> to vector<256x128xf32>
    %5 = arith.addf %2, %4 : vector<256x128xf32>
    %cst_5 = arith.constant 0.000000e+00 : f32
    %6 = vector.broadcast %cst_5 : f32 to vector<256x128xf32>
    %7 = arith.maximumf %5, %6 : vector<256x128xf32>
    %8 = arith.truncf %7 : vector<256x128xf32> to vector<256x128xbf16>
    %c0_6 = arith.constant 0 : index
    %c0_7 = arith.constant 0 : index
    %9 = vector.load %arg4[%c0_6, %c0_7] : memref<128x128xbf16, #tpu.memory_space<vmem>>, vector<128x128xbf16>
    %cst_8 = arith.constant dense<0.000000e+00> : vector<256x128xf32>
    %10 = tpu.matmul %8, %9, %cst_8 {dimension_numbers = #tpu.dot_dimension_numbers<[1], [0], [0], [1], [0, 0, 1, 1], [], []>} : vector<256x128xbf16>, vector<128x128xbf16>, vector<256x128xf32> -> vector<256x128xf32>
    %c0_9 = arith.constant 0 : index
    %c0_10 = arith.constant 0 : index
    %11 = vector.load %arg5[%c0_9, %c0_10] : memref<1x128xf32, #tpu.memory_space<vmem>>, vector<1x128xf32>
    %12 = vector.broadcast %11 : vector<1x128xf32> to vector<256x128xf32>
    %13 = arith.addf %10, %12 : vector<256x128xf32>
    %cst_11 = arith.constant 0.000000e+00 : f32
    %14 = vector.broadcast %cst_11 : f32 to vector<256x128xf32>
    %15 = arith.maximumf %13, %14 : vector<256x128xf32>
    %16 = arith.truncf %15 : vector<256x128xf32> to vector<256x128xbf16>
    %c0_12 = arith.constant 0 : index
    %c0_13 = arith.constant 0 : index
    %17 = vector.load %arg6[%c0_12, %c0_13] : memref<4x128xbf16, #tpu.memory_space<vmem>>, vector<4x128xbf16>
    %cst_14 = arith.constant dense<0.000000e+00> : vector<4x256xf32>
    %18 = tpu.matmul %17, %16, %cst_14 {dimension_numbers = #tpu.dot_dimension_numbers<[1], [1], [0], [0], [0, 0, 1, 0], [], []>} : vector<4x128xbf16>, vector<256x128xbf16>, vector<4x256xf32> -> vector<4x256xf32>
    %c0_15 = arith.constant 0 : index
    %c0_16 = arith.constant 0 : index
    %19 = vector.load %arg7[%c0_15, %c0_16] : memref<4x1xf32, #tpu.memory_space<vmem>>, vector<4x1xf32>
    %20 = vector.broadcast %19 : vector<4x1xf32> to vector<4x256xf32>
    %21 = arith.addf %18, %20 : vector<4x256xf32>
    %c0_17 = arith.constant 0 : index
    %c0_18 = arith.constant 0 : index
    %22 = vector.load %arg8[%c0_17, %c0_18] : memref<4x256xf32, #tpu.memory_space<vmem>>, vector<4x256xf32>
    tpu.vector_store %arg8[%c0_17, %c0_18], %21 {strides = array<i32>} : memref<4x256xf32, #tpu.memory_space<vmem>>, vector<4x256xf32>,
    return
  }
  func.func @transform_0(%arg0: i32) -> (i32, i32) {
    %c0_i32 = arith.constant 0 : i32
    %c0_i32_0 = arith.constant 0 : i32
    return %arg0, %c0_i32 : i32, i32
  }
  func.func @transform_1(%arg0: i32) -> (i32, i32) {
    %c0_i32 = arith.constant 0 : i32
    %c0_i32_0 = arith.constant 0 : i32
    %c0_i32_1 = arith.constant 0 : i32
    return %c0_i32, %c0_i32_0 : i32, i32
  }
  func.func @transform_2(%arg0: i32) -> (i32, i32) {
    %c0_i32 = arith.constant 0 : i32
    %c0_i32_0 = arith.constant 0 : i32
    %c0_i32_1 = arith.constant 0 : i32
    return %c0_i32, %c0_i32_0 : i32, i32
  }
  func.func @transform_3(%arg0: i32) -> (i32, i32) {
    %c0_i32 = arith.constant 0 : i32
    %c0_i32_0 = arith.constant 0 : i32
    %c0_i32_1 = arith.constant 0 : i32
    return %c0_i32, %c0_i32_0 : i32, i32
  }
  func.func @transform_4(%arg0: i32) -> (i32, i32) {
    %c0_i32 = arith.constant 0 : i32
    %c0_i32_0 = arith.constant 0 : i32
    %c0_i32_1 = arith.constant 0 : i32
    return %c0_i32, %c0_i32_0 : i32, i32
  }
  func.func @transform_5(%arg0: i32) -> (i32, i32) {
    %c0_i32 = arith.constant 0 : i32
    %c0_i32_0 = arith.constant 0 : i32
    %c0_i32_1 = arith.constant 0 : i32
    return %c0_i32, %c0_i32_0 : i32, i32
  }
  func.func @transform_6(%arg0: i32) -> (i32, i32) {
    %c0_i32 = arith.constant 0 : i32
    %c0_i32_0 = arith.constant 0 : i32
    %c0_i32_1 = arith.constant 0 : i32
    return %c0_i32, %c0_i32_0 : i32, i32
  }
  func.func @transform_7(%arg0: i32) -> (i32, i32) {
    %c0_i32 = arith.constant 0 : i32
    %c0_i32_0 = arith.constant 0 : i32
    return %c0_i32, %arg0 : i32, i32
  }
}

</mosaic_0001>

<bundles_post_ra>
// kernel: tpu_custom_call.1
= control target key start
LH: loop header
LB: loop body
LE: loop exit
PB: predicated region body
PF: predicated region fallthrough
CT: control target
= control target key end

     0   :  { %12 = vsyncpa [#allocation3], 0  ;;  %s1492_s0 = inlined_call_operand.vmem [shape: bf16[512,39], index: 0, kind: input, shape index: {}]   ;;  %s1493_s1 = inlined_call_operand.vmem [shape: bf16[39,128], index: 1, kind: input, shape index: {}]   ;;  %s1494_s2 = inlined_call_operand.vmem [shape: f32[1,128], index: 2, kind: input, shape index: {}]   ;;  %s1495_s3 = inlined_call_operand.vmem [shape: bf16[128,128], index: 3, kind: input, shape index: {}]   ;;  %s1496_s4 = inlined_call_operand.vmem [shape: f32[1,128], index: 4, kind: input, shape index: {}]   ;;  %s1497_s5 = inlined_call_operand.vmem [shape: bf16[4,128], index: 5, kind: input, shape index: {}]   ;;  %s1498_s6 = inlined_call_operand.vmem [shape: f32[4,1], index: 6, kind: input, shape index: {}]   ;;  %s1499_s7 = inlined_call_operand.hbm [shape: f32[4,512], index: 7, kind: output, shape index: {}]  }
   0x1   :  { %14 = vsyncpa [#allocation3 + $0x1], 0  ;;  %s1250_s24 = smov 0   ;;  %s1252_s25 = smov 0  }
   0x2   :  { %s1254_s26 = smov 0   ;;  %s1256_s27 = smov 0  }
   0x3 LB: > { %s1271_s28 = sadd.s32 4294967295, %s1206_s27   ;;  %s930_s29 = sadd.s32 4294967294, %s1206_s27   ;;  %s1206_s27 = sphi %s1256_s27, %s1505_s27   ;;  %s1202_s26 = sphi %s1254_s26, %s1504_s26   ;;  %s1198_s25 = sphi %s1252_s25, %s1503_s25   ;;  %s1194_s24 = sphi %s1250_s24, %s1502_s24  }
   0x4   : > { %s1275_s30 = sadd.s32 1, %s1206_s27   ;;  %s179_s8 = sadd.s32 1, %s1202_s26 }
   0x5   : > { %s176_s9 = ssub.s32 %s1206_s27, %s1275_s30  ;;  %p189_p0 = scmp.ne.s32.totalorder %s1202_s26, %s1198_s25 }
   0x6   : > { %p177_p1 = scmp.eq.s32.totalorder %s176_s9, 0  ;;  %p190_p2 = scmp.eq.s32.totalorder %s1271_s28, 1 }
   0x7   : > { %p195_p3 = scmp.ne.s32.totalorder %s1198_s25, %s1194_s24  ;;  %p196_p4 = scmp.eq.s32.totalorder %s930_s29, 1 }
   0x8   : > { %s1286_s10 = scalar_select %p177_p1, %s1202_s26, %s179_s8  }
   0x9   : > { %p1288_p5 = por %p190_p2, %p189_p0  ;;  %p1292_p6 = por %p196_p4, %p195_p3 }
   0xa   : > { %p933_p7 = scmp.ge.s32.totalorder %s1206_s27, 1  ;;  %p241_p8 = scmp.lt.s32.totalorder %s1206_s27, 3 }
   0xc   : > { %p242_p9 = pnand %p933_p7, %p241_p8 }
   0xd   : > { %s935_s15 = sshll.u32 (!%p242_p9), %s1271_s28, 5  ;;  %s270_s20 = sand.u32 (!%p242_p9), 1, %s1198_s25  }
   0xe   : > { %245 = sbr.rel (%p242_p9) target bundleno = 766 (0x2fe), region = 48  ;;  %p274_p10 = scmp.lt.s32.totalorder (!%p242_p9), %s935_s15, 63 }
   0xf   : > { %s934_s21 = sshll.u32 (!%p242_p9), %s270_s20, 3  ;;  %s1088_s22 = sshll.u32 (!%p242_p9), %s1271_s28, 3 }
  0x10   : > { %s866_s9 = scalar_lea.hbm (!%p242_p9), %s1499_s7, %s1088_s22  ;;  %s272_s13 = scalar_lea.vmem (!%p242_p9), [#allocation2], %s934_s21 }
  0x11   : > { %s868_s14 = sshll.u32 (!%p242_p9), %s272_s13, 4  ;;  %s1164_s19 = scalar_lea.hbm (!%p242_p9), %s1499_s7, 16  ;;  %s869_s14 = int_to_ptr.vmem [resolvable:$true] %s868_s14 }
  0x13   : > { %v317_v0 = vld [vmem:[%s1493_s1 + $0x10] sm:$0xf]  ;;  %vm466_vm0 = vcmask 1042432   ;;  %vm467_vm1 = vcmask 1043456   ;;  %v1208_v2 = vmov 65535   ;;  %s1507_s15 = smov (!%p274_p10, %s935_s15), 63 }
  0x14   : > { %v411_v1 = vunpack.c.l.b16 %v317_v0  ;;  %v468_v3 = vsel %vm466_vm0, 4294967295, %v1208_v2  ;;  %v1079_v7 = vld [vmem:[%s1493_s1 + $0x8] sm:$0xff]  ;;  %s936_s18 = sshll.u32 %s1507_s15, 2  ;;  %v1078_v8 = vld [vmem:[%s1493_s1] sm:$0xff]  ;;  %vm417_vm2 = vcmask 318464   ;;  %v1087_v14 = vld [vmem:[%s1495_s3 + $0x38] sm:$0xff] }
  0x15   : > { %v469_v4 = vsel %vm467_vm1, %v468_v3, 0  ;;  %s1312_s23 = scalar_lea.vmem %s1492_s0, %s936_s18  ;;  %678 = vmatpush.bf16.msra.mxu1 %v1087_v14  ;;  %1092 = vmatpush.bf16.msra.mxu2 %v1087_v14  ;;  %v1086_v16 = vld [vmem:[%s1495_s3 + $0x30] sm:$0xff]  ;;  %v1085_v17 = vld [vmem:[%s1495_s3 + $0x28] sm:$0xff]  ;;  %v1084_v18 = vld [vmem:[%s1495_s3 + $0x20] sm:$0xff]  ;;  %s855_s15 = scalar_lea.sflag [#allocation3], %s270_s20 }
  0x16   : > { %v414_v5 = vpack.c.b16 %v411_v1, %v411_v1  ;;  %v1062_v9 = vld [vmem:[%s1312_s23] sm:$0xff]  ;;  %v1063_v10 = vld [vmem:[%s1312_s23 + $0x8] sm:$0xff]  ;;  %v1064_v11 = vld [vmem:[%s1312_s23 + $0x10] sm:$0xff] }
  0x17   : > { %v1065_v12 = vld [vmem:[%s1312_s23 + $0x18] sm:$0xff]  ;;  %v1066_v13 = vld [vmem:[%s1312_s23 + $0x20] sm:$0xff]  ;;  %v1067_v15 = vld [vmem:[%s1312_s23 + $0x28] sm:$0xff] }
  0x18   : > { %v471_v6 = vand.u32 %v469_v4, %v414_v5  ;;  %v1083_v19 = vld [vmem:[%s1495_s3 + $0x18] sm:$0xff]  ;;  %v1068_v20 = vld [vmem:[%s1312_s23 + $0x30] sm:$0xff]  ;;  %v1081_v22 = vld [vmem:[%s1495_s3 + $0x8] sm:$0xff] }
  0x19   : > { %679 = vmatpush.bf16.msra.mxu1 %v1086_v16  ;;  %1093 = vmatpush.bf16.msra.mxu2 %v1086_v16  ;;  %v1082_v21 = vld [vmem:[%s1495_s3 + $0x10] sm:$0xff]  ;;  %v1080_v23 = vld [vmem:[%s1495_s3] sm:$0xff]  ;;  %v1069_v24 = vld [vmem:[%s1312_s23 + $0x38] sm:$0xff] }
  0x1a   : > { %478 = vmatpush.bf16.msra.mxu0 %v471_v6  ;;  %1089 = vmatpush.bf16.msra.mxu3 %v471_v6  ;;  %v1072_v25 = vld [vmem:[%s1312_s23 + $0x50] sm:$0xff]  ;;  %v1070_v26 = vld [vmem:[%s1312_s23 + $0x40] sm:$0xff]  ;;  %v1073_v29 = vld [vmem:[%s1312_s23 + $0x58] sm:$0xff] }
  0x1b   : > { %v1360_v28 = vld [vmem:[%s1494_s2] ss:$0 sm:$0xff]  ;;  %v1071_v36 = vld [vmem:[%s1312_s23 + $0x48] sm:$0xff]  ;;  %v1076_v54 = vld [vmem:[%s1312_s23 + $0x70] sm:$0xff] }
  0x1c   : > { %v1074_v38 = vld [vmem:[%s1312_s23 + $0x60] sm:$0xff]  ;;  %v1075_v46 = vld [vmem:[%s1312_s23 + $0x68] sm:$0xff]  ;;  %v1077_v62 = vld [vmem:[%s1312_s23 + $0x78] sm:$0xff]  ;;  %s870_s23 = sshll.u32 %s866_s9, 4  ;;  %s871_s23 = int_to_ptr.hbm [resolvable:$true] %s870_s23 }
  0x1d   : > { %680 = vmatpush.bf16.msra.mxu1 %v1085_v17  ;;  %1094 = vmatpush.bf16.msra.mxu2 %v1085_v17  ;;  %s1158_s28 = sshra.s32 %s871_s23, 4  ;;  %s1159_s28 = int_to_ptr.hbm [resolvable:$true] %s1158_s28 }
  0x1e   : > { %479 = vmatpush.bf16.msra.mxu0 %v1079_v7  ;;  %1090 = vmatpush.bf16.msra.mxu3 %v1079_v7  ;;  %s1160_s16 = scalar_lea.hbm %s1159_s28, 8  ;;  %p1165_p0 = scmp.lt.s32.totalorder %s1159_s28, %s1499_s7 }
  0x1f   : > { %p1161_p11 = scmp.ne.s32.totalorder %s1159_s28, %s1160_s16  ;;  %p1166_p1 = scmp.lt.s32.totalorder %s1164_s19, %s1160_s16 }
  0x21   : > { %681 = vmatpush.bf16.msra.mxu1 %v1084_v18  ;;  %1095 = vmatpush.bf16.msra.mxu2 %v1084_v18  ;;  %p1162_p12 = pnand %p1161_p11, %p1288_p5  ;;  %p1167_p2 = por %p1166_p1, %p1165_p0 }
  0x22   : > { %480 = vmatpush.bf16.msra.mxu0 %v1078_v8  ;;  %1091 = vmatpush.bf16.msra.mxu3 %v1078_v8 }
  0x23   : > { %p1163_p13 = pneg %p1162_p12 }
  0x25   : > { %1009 = vmatmul.msk.bf16.vlgmr.msra.gmra.mxu0 %vm417_vm2, %v1062_v9  ;;  %682 = vmatpush.bf16.msra.mxu1 %v1083_v19  ;;  %p1168_p3 = pnand %p1167_p2, %p1163_p13 }
  0x26   : > { %1096 = vmatpush.bf16.msra.mxu2 %v1083_v19  ;;  %1019 = vmatmul.msk.bf16.vlgmr.msra.gmra.mxu3 %vm417_vm2, %v1072_v25 }
  0x29   : > { %683 = vmatpush.bf16.msra.mxu1 %v1082_v21 }
  0x2a   : > { %1097 = vmatpush.bf16.msra.mxu2 %v1082_v21 }
  0x2d   : > { %684 = vmatpush.bf16.msra.mxu1 %v1081_v22 }
  0x2e   : > { %1098 = vmatpush.bf16.msra.mxu2 %v1081_v22 }
  0x31   : > { %685 = vmatpush.bf16.msra.mxu1 %v1080_v23 }
  0x32   : > { %1099 = vmatpush.bf16.msra.mxu2 %v1080_v23 }
  0x35   : > { %1010 = vmatmul.msk.bf16.gmra.mxu0 %vm417_vm2, %v1063_v10 }
  0x36   : > { %1020 = vmatmul.msk.bf16.gmra.mxu3 %vm417_vm2, %v1073_v29 }
  0x45   : > { %1011 = vmatmul.msk.bf16.gmra.mxu0 %vm417_vm2, %v1064_v11 }
  0x46   : > { %1021 = vmatmul.msk.bf16.gmra.mxu3 %vm417_vm2, %v1074_v38 }
  0x55   : > { %1012 = vmatmul.msk.bf16.gmra.mxu0 %vm417_vm2, %v1065_v12 }
  0x56   : > { %1022 = vmatmul.msk.bf16.gmra.mxu3 %vm417_vm2, %v1075_v46 }
  0x65   : > { %1013 = vmatmul.msk.bf16.gmra.mxu0 %vm417_vm2, %v1066_v13 }
  0x66   : > { %1023 = vmatmul.msk.bf16.gmra.mxu3 %vm417_vm2, %v1076_v54 }
  0x75   : > { %1014 = vmatmul.msk.bf16.gmra.mxu0 %vm417_vm2, %v1067_v15 }
  0x76   : > { %1024 = vmatmul.msk.bf16.gmra.mxu3 %vm417_vm2, %v1077_v62 }
  0x85   : > { %1015 = vmatmul.msk.bf16.gmra.mxu0 %vm417_vm2, %v1068_v20 }
  0x95   : > { %1016 = vmatmul.msk.bf16.gmra.mxu0 %vm417_vm2, %v1069_v24 }
  0xa2   : > { %v482_v27 = vpop.f32.mrf.mxu0 }
  0xa3   : > { %v483_v30 = vadd.f32 %v1360_v28, %v482_v27 }
  0xa5   : > { %1017 = vmatmul.msk.bf16.gmra.mxu0 %vm417_vm2, %v1070_v26  ;;  %v562_v33 = vmax.f32 %v483_v30, 0.0 }
  0xa9   : > { %v532_v27 = vpop.f32.mrf.mxu3 }
  0xaa   : > { %v484_v31 = vpop.f32.mrf.mxu0 }
  0xab   : > { %v485_v32 = vadd.f32 %v1360_v28, %v484_v31 }
  0xad   : > { %v563_v34 = vmax.f32 %v485_v32, 0.0 }
  0xaf   : > { %v594_v35 = vpack.c.bf16 %v563_v34, %v562_v33 }
  0xb1   : > { %686 = vmatmul.bf16.vlgmr.msra.gmra.mxu1 %v594_v35 }
  0xb2   : > { %v487_v37 = vpop.f32.mrf.mxu0 }
  0xb3   : > { %v488_v39 = vadd.f32 %v1360_v28, %v487_v37  ;;  %v1396_v37 = vld [vmem:[%s1496_s4] ss:$0 sm:$0xff] }
  0xb5   : > { %1018 = vmatmul.msk.bf16.gmra.mxu0 %vm417_vm2, %v1071_v36  ;;  %v564_v42 = vmax.f32 %v488_v39, 0.0  ;;  %v534_v36 = vpop.f32.mrf.mxu3 }
  0xba   : > { %v489_v40 = vpop.f32.mrf.mxu0 }
  0xbb   : > { %v490_v41 = vadd.f32 %v1360_v28, %v489_v40 }
  0xbd   : > { %v565_v43 = vmax.f32 %v490_v41, 0.0  ;;  %v537_v46 = vpop.f32.mrf.mxu3 }
  0xbf   : > { %v595_v44 = vpack.c.bf16 %v565_v43, %v564_v42 }
  0xc1   : > { %691 = vmatmul.bf16.gmra.mxu1 %v595_v44 }
  0xc2   : > { %v492_v45 = vpop.f32.mrf.mxu0 }
  0xc3   : > { %v493_v47 = vadd.f32 %v1360_v28, %v492_v45 }
  0xc5   : > { %v566_v50 = vmax.f32 %v493_v47, 0.0 }
  0xca   : > { %v494_v48 = vpop.f32.mrf.mxu0 }
  0xcb   : > { %v495_v49 = vadd.f32 %v1360_v28, %v494_v48 }
  0xcd   : > { %v567_v51 = vmax.f32 %v495_v49, 0.0 }
  0xcf   : > { %v596_v52 = vpack.c.bf16 %v567_v51, %v566_v50 }
  0xd1   : > { %696 = vmatmul.bf16.gmra.mxu1 %v596_v52 }
  0xd2   : > { %v497_v53 = vpop.f32.mrf.mxu0 }
  0xd3   : > { %v498_v55 = vadd.f32 %v1360_v28, %v497_v53  ;;  %v539_v53 = vpop.f32.mrf.mxu3 }
  0xd5   : > { %v568_v58 = vmax.f32 %v498_v55, 0.0 }
  0xda   : > { %v499_v56 = vpop.f32.mrf.mxu0 }
  0xdb   : > { %v500_v57 = vadd.f32 %v1360_v28, %v499_v56  ;;  %v533_v56 = vadd.f32 %v1360_v28, %v532_v27 }
  0xdd   : > { %v569_v59 = vmax.f32 %v500_v57, 0.0  ;;  %v535_v57 = vadd.f32 %v1360_v28, %v534_v36 }
  0xdf   : > { %v597_v60 = vpack.c.bf16 %v569_v59, %v568_v58  ;;  %v583_v62 = vmax.f32 %v535_v57, 0.0 }
  0xe1   : > { %701 = vmatmul.bf16.gmra.mxu1 %v597_v60 }
  0xe2   : > { %v502_v61 = vpop.f32.mrf.mxu0 }
  0xe3   : > { %v503_v63 = vadd.f32 %v1360_v28, %v502_v61  ;;  %v582_v61 = vmax.f32 %v533_v56, 0.0 }
  0xe5   : > { %v570_v2 = vmax.f32 %v503_v63, 0.0 }
  0xea   : > { %v504_v0 = vpop.f32.mrf.mxu0 }
  0xeb   : > { %v505_v1 = vadd.f32 %v1360_v28, %v504_v0 }
  0xed   : > { %v571_v3 = vmax.f32 %v505_v1, 0.0  ;;  %v542_v1 = vpop.f32.mrf.mxu3 }
  0xef   : > { %v598_v4 = vpack.c.bf16 %v571_v3, %v570_v2  ;;  %v604_v2 = vpack.c.bf16 %v583_v62, %v582_v61 }
  0xf1   : > { %706 = vmatmul.bf16.gmra.mxu1 %v598_v4 }
  0xf2   : > { %v507_v5 = vpop.f32.mrf.mxu0 }
  0xf3   : > { %v508_v6 = vadd.f32 %v1360_v28, %v507_v5  ;;  %v538_v5 = vadd.f32 %v1360_v28, %v537_v46 }
  0xf5   : > { %v572_v9 = vmax.f32 %v508_v6, 0.0  ;;  %v540_v6 = vadd.f32 %v1360_v28, %v539_v53 }
  0xfa   : > { %v509_v7 = vpop.f32.mrf.mxu0 }
  0xfb   : > { %v510_v8 = vadd.f32 %v1360_v28, %v509_v7 }
  0xfd   : > { %v573_v10 = vmax.f32 %v510_v8, 0.0  ;;  %v544_v8 = vpop.f32.mrf.mxu3 }
  0xff   : > { %v599_v11 = vpack.c.bf16 %v573_v10, %v572_v9 }
 0x101   : > { %711 = vmatmul.bf16.gmra.mxu1 %v599_v11  ;;  %v584_v11 = vmax.f32 %v538_v5, 0.0 }
 0x102   : > { %v512_v12 = vpop.f32.mrf.mxu0 }
 0x103   : > { %v513_v13 = vadd.f32 %v1360_v28, %v512_v12  ;;  %v585_v12 = vmax.f32 %v540_v6, 0.0 }
 0x105   : > { %v574_v16 = vmax.f32 %v513_v13, 0.0 }
 0x10a   : > { %v514_v14 = vpop.f32.mrf.mxu0 }
 0x10b   : > { %v515_v15 = vadd.f32 %v1360_v28, %v514_v14 }
 0x10d   : > { %v575_v17 = vmax.f32 %v515_v15, 0.0  ;;  %v605_v15 = vpack.c.bf16 %v585_v12, %v584_v11 }
 0x10f   : > { %v600_v18 = vpack.c.bf16 %v575_v17, %v574_v16  ;;  %v547_v16 = vpop.f32.mrf.mxu3 }
 0x111   : > { %716 = vmatmul.bf16.gmra.mxu1 %v600_v18 }
 0x112   : > { %v517_v19 = vpop.f32.mrf.mxu0 }
 0x113   : > { %v518_v20 = vadd.f32 %v1360_v28, %v517_v19  ;;  %v543_v19 = vadd.f32 %v1360_v28, %v542_v1 }
 0x115   : > { %v576_v23 = vmax.f32 %v518_v20, 0.0  ;;  %v545_v20 = vadd.f32 %v1360_v28, %v544_v8 }
 0x117   : > { %v549_v27 = vpop.f32.mrf.mxu3 }
 0x11a   : > { %v519_v21 = vpop.f32.mrf.mxu0 }
 0x11b   : > { %v520_v22 = vadd.f32 %v1360_v28, %v519_v21 }
 0x11d   : > { %v577_v24 = vmax.f32 %v520_v22, 0.0 }
 0x11f   : > { %v601_v25 = vpack.c.bf16 %v577_v24, %v576_v23  ;;  %v586_v24 = vmax.f32 %v543_v19, 0.0 }
 0x121   : > { %721 = vmatmul.bf16.gmra.mxu1 %v601_v25  ;;  %v587_v25 = vmax.f32 %v545_v20, 0.0 }
 0x122   : > { %v522_v26 = vpop.f32.mrf.mxu0 }
 0x123   : > { %v523_v29 = vadd.f32 %v1360_v28, %v522_v26 }
 0x125   : > { %v578_v32 = vmax.f32 %v523_v29, 0.0 }
 0x12a   : > { %v524_v30 = vpop.f32.mrf.mxu0 }
 0x12b   : > { %v525_v31 = vadd.f32 %v1360_v28, %v524_v30  ;;  %v606_v30 = vpack.c.bf16 %v587_v25, %v586_v24 }
 0x12d   : > { %v579_v33 = vmax.f32 %v525_v31, 0.0 }
 0x12e   : > { %v687_v34 = vpop.f32.mrf.mxu1 }
 0x12f   : > { %v602_v35 = vpack.c.bf16 %v579_v33, %v578_v32  ;;  %v688_v39 = vadd.f32 %v1396_v37, %v687_v34  ;;  %v552_v33 = vpop.f32.mrf.mxu3  ;;  %v548_v34 = vadd.f32 %v1360_v28, %v547_v16 }
 0x131   : > { %726 = vmatmul.bf16.gmra.mxu1 %v602_v35  ;;  %v767_v42 = vmax.f32 %v688_v39, 0.0  ;;  %v550_v35 = vadd.f32 %v1360_v28, %v549_v27 }
 0x132   : > { %v527_v38 = vpop.f32.mrf.mxu0 }
 0x133   : > { %v528_v43 = vadd.f32 %v1360_v28, %v527_v38 }
 0x135   : > { %v580_v49 = vmax.f32 %v528_v43, 0.0 }
 0x136   : > { %v689_v40 = vpop.f32.mrf.mxu1 }
 0x137   : > { %v690_v41 = vadd.f32 %v1396_v37, %v689_v40  ;;  %v588_v40 = vmax.f32 %v548_v34, 0.0 }
 0x139   : > { %v768_v44 = vmax.f32 %v690_v41, 0.0  ;;  %v589_v41 = vmax.f32 %v550_v35, 0.0 }
 0x13a   : > { %v529_v45 = vpop.f32.mrf.mxu0 }
 0x13b   : > { %v530_v47 = vadd.f32 %v1360_v28, %v529_v45  ;;  %v1402_v48 = vpack.c.bf16 %v768_v44, %v767_v42  ;;  %v607_v44 = vpack.c.bf16 %v589_v41, %v588_v40  ;;  %v554_v45 = vpop.f32.mrf.mxu3 }
 0x13d   : > { %v581_v50 = vmax.f32 %v530_v47, 0.0  ;;  %v553_v47 = vadd.f32 %v1360_v28, %v552_v33 }
 0x13e   : > { %v692_v51 = vpop.f32.mrf.mxu1 }
 0x13f   : > { %v603_v52 = vpack.c.bf16 %v581_v50, %v580_v49  ;;  %v693_v54 = vadd.f32 %v1396_v37, %v692_v51  ;;  %v555_v49 = vadd.f32 %v1360_v28, %v554_v45  ;;  %v590_v51 = vmax.f32 %v553_v47, 0.0 }
 0x141   : > { %731 = vmatmul.bf16.vlgmr.msra.gmra.mxu2 %v603_v52  ;;  %v769_v59 = vmax.f32 %v693_v54, 0.0  ;;  %v591_v52 = vmax.f32 %v555_v49, 0.0 }
 0x143   : > { %v557_v50 = vpop.f32.mrf.mxu3  ;;  %v608_v54 = vpack.c.bf16 %v591_v52, %v590_v51 }
 0x144   : > { %v558_v57 = vadd.f32 %v1360_v28, %v557_v50 }
 0x146   : > { %v694_v55 = vpop.f32.mrf.mxu1 }
 0x147   : > { %v695_v58 = vadd.f32 %v1396_v37, %v694_v55 }
 0x149   : > { %v770_v60 = vmax.f32 %v695_v58, 0.0 }
 0x14b   : > { %v1408_v63 = vpack.c.bf16 %v770_v60, %v769_v59  ;;  %v559_v55 = vpop.f32.mrf.mxu3  ;;  %v592_v59 = vmax.f32 %v558_v57, 0.0 }
 0x14c   : > { %v560_v58 = vadd.f32 %v1360_v28, %v559_v55 }
 0x14e   : > { %v697_v0 = vpop.f32.mrf.mxu1  ;;  %v593_v60 = vmax.f32 %v560_v58, 0.0 }
 0x14f   : > { %v698_v3 = vadd.f32 %v1396_v37, %v697_v0 }
 0x150   : > { %v609_v62 = vpack.c.bf16 %v593_v60, %v592_v59 }
 0x151   : > { %736 = vmatmul.bf16.gmra.mxu2 %v604_v2  ;;  %v771_v9 = vmax.f32 %v698_v3, 0.0 }
 0x156   : > { %v699_v4 = vpop.f32.mrf.mxu1 }
 0x157   : > { %v700_v7 = vadd.f32 %v1396_v37, %v699_v4 }
 0x159   : > { %v772_v10 = vmax.f32 %v700_v7, 0.0 }
 0x15b   : > { %v1414_v13 = vpack.c.bf16 %v772_v10, %v771_v9 }
 0x15e   : > { %v702_v14 = vpop.f32.mrf.mxu1 }
 0x15f   : > { %v703_v17 = vadd.f32 %v1396_v37, %v702_v14 }
 0x161   : > { %741 = vmatmul.bf16.gmra.mxu2 %v605_v15  ;;  %v773_v22 = vmax.f32 %v703_v17, 0.0 }
 0x166   : > { %v704_v18 = vpop.f32.mrf.mxu1 }
 0x167   : > { %v705_v21 = vadd.f32 %v1396_v37, %v704_v18 }
 0x169   : > { %v774_v23 = vmax.f32 %v705_v21, 0.0 }
 0x16b   : > { %v802_v26 = vpack.c.bf16 %v774_v23, %v773_v22 }
 0x16e   : > { %v707_v29 = vpop.f32.mrf.mxu1 }
 0x16f   : > { %v708_v31 = vadd.f32 %v1396_v37, %v707_v29 }
 0x171   : > { %746 = vmatmul.bf16.gmra.mxu2 %v606_v30  ;;  %v775_v38 = vmax.f32 %v708_v31, 0.0 }
 0x176   : > { %v709_v32 = vpop.f32.mrf.mxu1 }
 0x177   : > { %v710_v36 = vadd.f32 %v1396_v37, %v709_v32 }
 0x179   : > { %v776_v39 = vmax.f32 %v710_v36, 0.0 }
 0x17b   : > { %v803_v42 = vpack.c.bf16 %v776_v39, %v775_v38 }
 0x17e   : > { %v712_v43 = vpop.f32.mrf.mxu1 }
 0x17f   : > { %v713_v11 = vadd.f32 %v1396_v37, %v712_v43 }
 0x181   : > { %751 = vmatmul.bf16.gmra.mxu2 %v607_v44  ;;  %v777_v14 = vmax.f32 %v713_v11, 0.0 }
 0x186   : > { %v714_v46 = vpop.f32.mrf.mxu1 }
 0x187   : > { %v715_v9 = vadd.f32 %v1396_v37, %v714_v46 }
 0x189   : > { %v778_v12 = vmax.f32 %v715_v9, 0.0 }
 0x18b   : > { %v804_v15 = vpack.c.bf16 %v778_v12, %v777_v14 }
 0x18e   : > { %v717_v53 = vpop.f32.mrf.mxu1 }
 0x18f   : > { %v718_v7 = vadd.f32 %v1396_v37, %v717_v53 }
 0x191   : > { %756 = vmatmul.bf16.gmra.mxu2 %v608_v54  ;;  %v779_v28 = vmax.f32 %v718_v7, 0.0 }
 0x196   : > { %v719_v56 = vpop.f32.mrf.mxu1 }
 0x197   : > { %v720_v5 = vadd.f32 %v1396_v37, %v719_v56 }
 0x199   : > { %v780_v8 = vmax.f32 %v720_v5, 0.0 }
 0x19b   : > { %v805_v10 = vpack.c.bf16 %v780_v8, %v779_v28 }
 0x19e   : > { %v722_v61 = vpop.f32.mrf.mxu1 }
 0x19f   : > { %v723_v0 = vadd.f32 %v1396_v37, %v722_v61 }
 0x1a1   : > { %761 = vmatmul.bf16.gmra.mxu2 %v609_v62  ;;  %v781_v3 = vmax.f32 %v723_v0, 0.0 }
 0x1a6   : > { %v724_v1 = vpop.f32.mrf.mxu1 }
 0x1a7   : > { %v725_v2 = vadd.f32 %v1396_v37, %v724_v1 }
 0x1a9   : > { %v782_v4 = vmax.f32 %v725_v2, 0.0  ;;  %v815_v2 = vld [vmem:[%s1497_s5] sm:$0x3] }
 0x1ab   : > { %v806_v6 = vpack.c.bf16 %v782_v4, %v781_v3  ;;  %v816_v3 = vld [vmem:[%s1498_s6] sm:$0xf]  ;;  %v1209_v4 = vmov 0  }
 0x1ac   : > { %1141 = vset.pattern.permute.xlu0 %v1209_v4 }
 0x1ad   : > { %822 = vmatpush.bf16.xpose.msrb.mxu2 %v806_v6  ;;  %819 = vperm.xlu0 %1141, %v816_v3  }
 0x1ae   : > { %v727_v5 = vpop.f32.mrf.mxu1 }
 0x1af   : > { %v728_v8 = vadd.f32 %v1396_v37, %v727_v5 }
 0x1b1   : > { %v783_v9 = vmax.f32 %v728_v8, 0.0 }
 0x1b5   : > { %823 = vmatpush.bf16.xpose.msrb.mxu2 %v805_v10 }
 0x1b6   : > { %v729_v6 = vpop.f32.mrf.mxu1 }
 0x1b7   : > { %v730_v7 = vadd.f32 %v1396_v37, %v729_v6 }
 0x1b9   : > { %v784_v28 = vmax.f32 %v730_v7, 0.0 }
 0x1bb   : > { %v807_v10 = vpack.c.bf16 %v784_v28, %v783_v9 }
 0x1bd   : > { %824 = vmatpush.bf16.xpose.msrb.mxu2 %v804_v15 }
 0x1c4   : > { %v732_v16 = vpop.f32.mrf.mxu2 }
 0x1c5   : > { %825 = vmatpush.bf16.xpose.msrb.mxu2 %v803_v42  ;;  %v733_v17 = vadd.f32 %v1396_v37, %v732_v16 }
 0x1c7   : > { %v785_v20 = vmax.f32 %v733_v17, 0.0 }
 0x1cc   : > { %v734_v18 = vpop.f32.mrf.mxu2 }
 0x1cd   : > { %v735_v19 = vadd.f32 %v1396_v37, %v734_v18  ;;  %826 = vmatpush.bf16.xpose.msrb.mxu2 %v802_v26 }
 0x1cf   : > { %v786_v21 = vmax.f32 %v735_v19, 0.0 }
 0x1d1   : > { %v808_v22 = vpack.c.bf16 %v786_v21, %v785_v20 }
 0x1d4   : > { %v737_v23 = vpop.f32.mrf.mxu2 }
 0x1d5   : > { %827 = vmatpush.bf16.xpose.msrb.mxu2 %v1414_v13  ;;  %v738_v24 = vadd.f32 %v1396_v37, %v737_v23 }
 0x1d7   : > { %v787_v29 = vmax.f32 %v738_v24, 0.0 }
 0x1dc   : > { %v739_v25 = vpop.f32.mrf.mxu2 }
 0x1dd   : > { %v740_v27 = vadd.f32 %v1396_v37, %v739_v25  ;;  %828 = vmatpush.bf16.xpose.msrb.mxu2 %v1408_v63 }
 0x1df   : > { %v788_v30 = vmax.f32 %v740_v27, 0.0 }
 0x1e1   : > { %v809_v31 = vpack.c.bf16 %v788_v30, %v787_v29 }
 0x1e4   : > { %v742_v32 = vpop.f32.mrf.mxu2 }
 0x1e5   : > { %829 = vmatpush.bf16.xpose.msrb.mxu2 %v1402_v48  ;;  %v743_v26 = vadd.f32 %v1396_v37, %v742_v32 }
 0x1e7   : > { %v789_v35 = vmax.f32 %v743_v26, 0.0 }
 0x1ec   : > { %v744_v33 = vpop.f32.mrf.mxu2  ;;  %830 = vmatmul.bf16.vlgmr.msrb.gmra.mxu2 %v815_v2 }
 0x1ed   : > { %v745_v34 = vadd.f32 %v1396_v37, %v744_v33 }
 0x1ef   : > { %v790_v13 = vmax.f32 %v745_v34, 0.0 }
 0x1f1   : > { %v810_v36 = vpack.c.bf16 %v790_v13, %v789_v35 }
 0x1f4   : > { %v747_v38 = vpop.f32.mrf.mxu2 }
 0x1f5   : > { %v748_v39 = vadd.f32 %v1396_v37, %v747_v38 }
 0x1f7   : > { %v791_v41 = vmax.f32 %v748_v39, 0.0 }
 0x1fc   : > { %v749_v40 = vpop.f32.mrf.mxu2 }
 0x1fd   : > { %v750_v63 = vadd.f32 %v1396_v37, %v749_v40 }
 0x1ff   : > { %v792_v42 = vmax.f32 %v750_v63, 0.0 }
 0x201   : > { %v811_v43 = vpack.c.bf16 %v792_v42, %v791_v41 }
 0x204   : > { %v752_v44 = vpop.f32.mrf.mxu2 }
 0x205   : > { %v753_v61 = vadd.f32 %v1396_v37, %v752_v44 }
 0x207   : > { %v793_v0 = vmax.f32 %v753_v61, 0.0 }
 0x20c   : > { %v754_v45 = vpop.f32.mrf.mxu2 }
 0x20d   : > { %v755_v59 = vadd.f32 %v1396_v37, %v754_v45 }
 0x20f   : > { %v794_v62 = vmax.f32 %v755_v59, 0.0 }
 0x211   : > { %v812_v1 = vpack.c.bf16 %v794_v62, %v793_v0 }
 0x214   : > { %v757_v48 = vpop.f32.mrf.mxu2 }
 0x215   : > { %v758_v56 = vadd.f32 %v1396_v37, %v757_v48 }
 0x217   : > { %v795_v58 = vmax.f32 %v758_v56, 0.0 }
 0x21c   : > { %v759_v46 = vpop.f32.mrf.mxu2 }
 0x21d   : > { %v760_v54 = vadd.f32 %v1396_v37, %v759_v46 }
 0x21f   : > { %v796_v57 = vmax.f32 %v760_v54, 0.0  ;;  %v820_v14 = vpop.permute.xlu0 %819 }
 0x221   : > { %v813_v60 = vpack.c.bf16 %v796_v57, %v795_v58 }
 0x224   : > { %v762_v47 = vpop.f32.mrf.mxu2 }
 0x225   : > { %v763_v49 = vadd.f32 %v1396_v37, %v762_v47 }
 0x227   : > { %v797_v52 = vmax.f32 %v763_v49, 0.0 }
 0x22c   : > { %v764_v50 = vpop.f32.mrf.mxu2 }
 0x22d   : > { %v765_v51 = vadd.f32 %v1396_v37, %v764_v50 }
 0x22f   : > { %v798_v53 = vmax.f32 %v765_v51, 0.0 }
 0x231   : > { %v814_v55 = vpack.c.bf16 %v798_v53, %v797_v52 }
 0x233   : > { %835 = vmatpush.bf16.xpose.msrb.mxu3 %v814_v55 }
 0x23b   : > { %836 = vmatpush.bf16.xpose.msrb.mxu3 %v813_v60 }
 0x243   : > { %837 = vmatpush.bf16.xpose.msrb.mxu3 %v812_v1 }
 0x24b   : > { %838 = vmatpush.bf16.xpose.msrb.mxu3 %v811_v43 }
 0x253   : > { %839 = vmatpush.bf16.xpose.msrb.mxu3 %v810_v36 }
 0x25b   : > { %840 = vmatpush.bf16.xpose.msrb.mxu3 %v809_v31 }
 0x263   : > { %841 = vmatpush.bf16.xpose.msrb.mxu3 %v808_v22 }
 0x26b   : > { %842 = vmatpush.bf16.xpose.msrb.mxu3 %v807_v10 }
 0x26f   : > { %v831_v11 = vpop.f32.mrf.mxu2 }
 0x270   : > { %v832_v37 = vadd.f32 %v831_v11, %v820_v14 }
 0x272   : > { %843 = vmatmul.bf16.vlgmr.msrb.gmra.mxu3 %v815_v2 }
 0x277   : > { %v833_v12 = vpop.f32.mrf.mxu2 }
 0x2f5   : > { %v844_v15 = vpop.f32.mrf.mxu3 }
 0x2f6   : > { %v845_v16 = vadd.f32 %v844_v15, %v820_v14 }
 0x2f8   : > { %v850_v17 = vrot.slane %v845_v16, 4 }
 0x2fa   : > { %v851_v18 = vsel %vm467_vm1, %v832_v37, %v850_v17 }
 0x2fb   : > { %853 = vst [vmem:[%s272_s13] sm:$0xff] %v851_v18 }
 0x2fc   : > { %1171 = shalt.err (!%p1168_p3)
}
 0x2fd   : > { %1100 = dma.vmem_to_hbm [thread:$0]  (%p1288_p5), %s869_s14, 128, %s871_s23, %s855_s15   ;;  %v846_v19 = vpop.f32.mrf.mxu3 }
 0x2fe PF: > { %p1106_p4 = scmp.ge.s32.totalorder %s1206_s27, 2  ;;  %s882_s20 = sand.u32 1, %s1194_s24  }
 0x2ff   : > { %s883_s29 = scalar_lea.sflag [#allocation3], %s882_s20 }
 0x300   : > { %p1103_p7 = pnand %p1106_p4, %p1292_p6 }
 0x302   : > { %p1104_p8 = pneg %p1103_p7 }
 0x304   : > { %1189 = dma.done.wait (%p1104_p8), %s883_s29, 128  }
 0x305   : > { %1191 = vsyncadd (%p1104_p8), %s883_s29, 4294967168  ;;  %p17_p9 = scmp.ge.s32.totalorder %s1275_s30, 4   ;;  %s1502_s24 = smov %s1198_s25 }
 0x306   : > { %s1503_s25 = smov %s1202_s26  ;;  %s1504_s26 = smov %s1286_s10 }
 0x307   : > { %s1505_s27 = smov %s1275_s30  ;;  %19 = sbr.rel (!%p17_p9) target bundleno = 3 (0x3), region = 83 }
 0x30c   :  { %889 = vsyncpa [#allocation3], 1 }
 0x30d   :  { %891 = vsyncpa [#allocation3 + $0x1], 1 }

</bundles_post_ra>
